<compile_context>
chip_gen: v6e
topology: v6e:2x2x1
jax: 0.10.0
libtpu: 0.0.40
codegen_flags: <defaults>
</compile_context>

<pallas_src>
import numpy as np
import jax
import jax.numpy as jnp
from jax.experimental import pallas as pl
from jax.experimental.pallas import tpu as pltpu


def _round_up(x, m):
    return ((x + m - 1) // m) * m


def _mean_agg_kernel(x_ref, inv_ref, o_ref):
    """x_ref: VMEM (TN, R, D); inv_ref: VMEM (TN, 1) f32; o_ref: VMEM (TN, D).

    Invariant (enforced by the wrapper): rows >= count for each node are zero,
    so the unmasked sum over the row axis equals the masked sum.
    mean = sum * (1 / count).
    """
    s = jnp.sum(x_ref[...].astype(jnp.float32), axis=1)      # (TN, D)
    o_ref[...] = (s * inv_ref[...]).astype(o_ref.dtype)


def mean_aggregator(gene_features):
    """JAX/Pallas equivalent of MeanAggregator.forward.

    gene_features: dict[key -> jnp.ndarray of shape (n_i, feature_dim)]
    returns: (num_nodes, feature_dim) array, rows ordered by sorted(keys).
    """
    node_seq = sorted(gene_features.keys())
    feats = [gene_features[k] for k in node_seq]
    N = len(feats)
    D = int(feats[0].shape[1])
    dtype = feats[0].dtype
    itemsize = jnp.dtype(dtype).itemsize

    max_rows = max(int(f.shape[0]) for f in feats)
    R = _round_up(max(max_rows, 1), 8)         # rows -> sublanes, pad to 8

    # --- choose nodes-per-step (TN) against a conservative VMEM budget ------
    # Double-buffered input tile must fit ~24 MiB; cap at 256 nodes per step.
    # This stays well inside v7x's 64 MiB VMEM and v6e/v5e's 128 MiB.
    vmem_budget = 24 * 1024 * 1024
    per_node_in = 2 * R * D * itemsize         # 2x for double buffering
    tn = max(8, (vmem_budget // max(per_node_in, 1)) // 8 * 8)
    tn = int(min(tn, 256, _round_up(N, 8)))
    Np = _round_up(N, tn)                      # pad node count to a TN multiple

    # --- dense zero-padded layout (N, R, D); zero-fill is the mask invariant -
    padded = jnp.stack(
        [jnp.pad(f, ((0, R - f.shape[0]), (0, 0))) for f in feats]
    )                                          # (N, R, D)
    if Np > N:
        padded = jnp.pad(padded, ((0, Np - N), (0, 0), (0, 0)))

    # Precomputed reciprocals.  A real node with 0 rows gives inf -> 0*inf=NaN,
    # matching torch.mean over an empty tensor.  Padded slots use count=1.
    counts = np.array(
        [f.shape[0] for f in feats] + [1] * (Np - N), dtype=np.float32
    )
    inv = jnp.asarray(1.0 / counts, dtype=jnp.float32).reshape(Np, 1)

    out = pl.pallas_call(
        _mean_agg_kernel,
        out_shape=jax.ShapeDtypeStruct((Np, D), dtype),
        grid=(Np // tn,),
        in_specs=[
            pl.BlockSpec((tn, R, D), lambda i: (i, 0, 0)),
            pl.BlockSpec((tn, 1), lambda i: (i, 0)),
        ],
        out_specs=pl.BlockSpec((tn, D), lambda i: (i, 0)),
        compiler_params=pltpu.CompilerParams(
            dimension_semantics=("parallel",),          # megacore split on v7x
            vmem_limit_bytes=48 * 1024 * 1024,
        ),
    )(padded, inv)
    return out[:N]
    # TODO(synk): for heavily skewed row counts, switch to a flat (total_rows, D)
    # segment layout with scalar-prefetched offsets to avoid reading padded bytes.


if __name__ == "__main__":
    key = jax.random.PRNGKey(0)
    feature_dim = 32
    # Ragged dict of per-gene features (different numbers of rows per gene).
    row_counts = {
        "geneB": 5, "geneA": 8, "geneD": 3, "geneC": 7, "geneF": 12,
        "geneE": 1, "geneH": 9, "geneG": 16, "geneJ": 6, "geneI": 11,
    }
    gene_features = {}
    for name in sorted(row_counts.keys()):
        key, sub = jax.random.split(key)
        gene_features[name] = jax.random.normal(
            sub, (row_counts[name], feature_dim), dtype=jnp.float32
        )

    out = jax.block_until_ready(mean_aggregator(gene_features))

    # Pure-JAX reference (same semantics as the PyTorch module).
    ref = jnp.stack(
        [jnp.mean(gene_features[k], axis=0) for k in sorted(gene_features.keys())]
    )
    assert out.shape == (len(gene_features), feature_dim)
    np.testing.assert_allclose(np.asarray(out), np.asarray(ref), rtol=1e-5, atol=1e-5)

    print("KERNEL_OK")
</pallas_src>

<mosaic_0001>
module attributes {stable_mosaic.version = 11 : i64} {
  func.func @_mean_agg_kernel(%arg0: i32, %arg1: memref<16x16x32xf32, #tpu.memory_space<vmem>>, %arg2: memref<16x1xf32, #tpu.memory_space<vmem>>, %arg3: memref<16x32xf32, #tpu.memory_space<vmem>>) attributes {dimension_semantics = [#tpu.dimension_semantics<parallel>], iteration_bounds = array<i64: 1>, scalar_prefetch = 0 : i64, scratch_operands = 0 : i64, tpu.core_type = #tpu.core_type<tc>, window_params = [{transform_indices = @transform_0, window_bounds = array<i64: 16, 16, 32>}, {transform_indices = @transform_1, window_bounds = array<i64: 16, 1>}, {transform_indices = @transform_2, window_bounds = array<i64: 16, 32>}]} {
    %c0 = arith.constant 0 : index
    %c0_0 = arith.constant 0 : index
    %c0_1 = arith.constant 0 : index
    %0 = vector.load %arg1[%c0, %c0_0, %c0_1] : memref<16x16x32xf32, #tpu.memory_space<vmem>>, vector<16x16x32xf32>
    %cst = arith.constant dense<0.000000e+00> : vector<16x32xf32>
    %1 = vector.multi_reduction <add>, %0, %cst [1] : vector<16x16x32xf32> to vector<16x32xf32>
    %c0_2 = arith.constant 0 : index
    %c0_3 = arith.constant 0 : index
    %2 = vector.load %arg2[%c0_2, %c0_3] : memref<16x1xf32, #tpu.memory_space<vmem>>, vector<16x1xf32>
    %3 = vector.broadcast %2 : vector<16x1xf32> to vector<16x32xf32>
    %4 = arith.mulf %1, %3 : vector<16x32xf32>
    %c0_4 = arith.constant 0 : index
    %c0_5 = arith.constant 0 : index
    %5 = vector.load %arg3[%c0_4, %c0_5] : memref<16x32xf32, #tpu.memory_space<vmem>>, vector<16x32xf32>
    tpu.vector_store %arg3[%c0_4, %c0_5], %4 {strides = array<i32>} : memref<16x32xf32, #tpu.memory_space<vmem>>, vector<16x32xf32>,
    return
  }
  func.func @transform_0(%arg0: i32) -> (i32, i32, i32) {
    %c0_i32 = arith.constant 0 : i32
    %c0_i32_0 = arith.constant 0 : i32
    %c0_i32_1 = arith.constant 0 : i32
    return %arg0, %c0_i32, %c0_i32_0 : i32, i32, i32
  }
  func.func @transform_1(%arg0: i32) -> (i32, i32) {
    %c0_i32 = arith.constant 0 : i32
    %c0_i32_0 = arith.constant 0 : i32
    return %arg0, %c0_i32 : i32, i32
  }
  func.func @transform_2(%arg0: i32) -> (i32, i32) {
    %c0_i32 = arith.constant 0 : i32
    %c0_i32_0 = arith.constant 0 : i32
    return %arg0, %c0_i32 : i32, i32
  }
}

</mosaic_0001>

<bundles_post_ra>
// kernel: tpu_custom_call.1
= control target key start
LH: loop header
LB: loop body
LE: loop exit
PB: predicated region body
PF: predicated region fallthrough
CT: control target
= control target key end

     0   :  { %7 = vsyncpa [#allocation3], 0  ;;  %s471_s0 = inlined_call_operand.hbm [shape: f32[16,16,32], index: 0, kind: input, shape index: {}]   ;;  %s472_s1 = inlined_call_operand.vmem [shape: f32[16,1], index: 1, kind: input, shape index: {}]   ;;  %s473_s2 = inlined_call_operand.hbm [shape: f32[16,32], index: 2, kind: output, shape index: {}]  }
   0x1   :  { %8 = vsyncpa [#allocation4], 0  ;;  %s381_s9 = smov [#allocation2]  }
   0x2   :  { %s14_s10 = sshll.u32 %s381_s9, 4  ;;  %s15_s10 = int_to_ptr.vmem [resolvable:$true] %s14_s10 }
   0x3   :  { %s345_s11 = scalar_lea.vmem %s15_s10, 4096  ;;  %p350_p1 = scmp.lt.s32.totalorder %s15_s10, %s15_s10 }
   0x4   :  { %p346_p0 = scmp.ne.s32.totalorder %s15_s10, %s345_s11  ;;  %p351_p2 = scmp.lt.s32.totalorder %s345_s11, %s345_s11 }
   0x6   :  { %p352_p3 = por %p351_p2, %p350_p1 }
   0x8   :  { %p353_p4 = pnand %p352_p3, %p346_p0 }
   0xa   :  { %356 = shalt.err (!%p353_p4)
}
   0xb   :  { %s382_s12 = smov 128   ;;  %s383_s13 = smov 8  }
   0xc   :  { %20 = dma.hbm_to_vmem [thread:$0]  %s471_s0, 4096, %s15_s10, [#allocation3], %s382_s12, %s382_s12, %s383_s13  }
   0xd   :  { %377 = dma.done.wait [#allocation3], 4096  }
   0xe   :  { %378 = vsyncadd [#allocation3], 4294963200  ;;  %v384_v0 = vmov 0   ;;  %v203_v1 = vld [vmem:[%s472_s1] sm:$0xff]  ;;  %v204_v2 = vld [vmem:[%s472_s1 + $0x8] sm:$0xff]  ;;  %vm58_vm0 = vcmask 261120  }
   0xf   :  { %336 = vset.pattern.permute.xlu0 %v384_v0  ;;  %v26_v3 = vld [vmem:[#allocation2] sm:$0xff]  ;;  %v27_v4 = vld [vmem:[#allocation2 + $0x8] sm:$0xff]  ;;  %v28_v5 = vld [vmem:[#allocation2 + $0x10] sm:$0xff]  ;;  %vm276_vm1 = vcmask 1041409   ;;  %vm279_vm2 = vcmask 1042434   ;;  %vm282_vm3 = vcmask 1043459  }
  0x10   :  { %207 = vperm.xlu0 %336, %v203_v1   ;;  %v29_v6 = vld [vmem:[#allocation2 + $0x18] sm:$0xff]  ;;  %v30_v7 = vld [vmem:[#allocation2 + $0x20] sm:$0xff]  ;;  %v31_v8 = vld [vmem:[#allocation2 + $0x28] sm:$0xff]  ;;  %v59_v9 = vsel %vm58_vm0, %v26_v3, 0.0  ;;  %v60_v10 = vsel %vm58_vm0, %v27_v4, 0.0  ;;  %v68_v19 = vsel %vm58_vm0, %v28_v5, 0.0 }
  0x11   :  { %v42_v11 = vld [vmem:[#allocation2 + $0x80] sm:$0xff]  ;;  %v43_v12 = vld [vmem:[#allocation2 + $0x88] sm:$0xff]  ;;  %v44_v13 = vld [vmem:[#allocation2 + $0x90] sm:$0xff]  ;;  %v415_v18 = vadd.f32 %v60_v10, %v59_v9  ;;  %v69_v20 = vsel %vm58_vm0, %v29_v6, 0.0  ;;  %v77_v21 = vsel %vm58_vm0, %v30_v7, 0.0  ;;  %v78_v25 = vsel %vm58_vm0, %v31_v8, 0.0 }
  0x12   :  { %v45_v14 = vld [vmem:[#allocation2 + $0x98] sm:$0xff]  ;;  %v46_v15 = vld [vmem:[#allocation2 + $0xa0] sm:$0xff]  ;;  %v47_v16 = vld [vmem:[#allocation2 + $0xa8] sm:$0xff]  ;;  %v131_v26 = vsel %vm58_vm0, %v42_v11, 0.0  ;;  %v132_v27 = vsel %vm58_vm0, %v43_v12, 0.0  ;;  %v140_v28 = vsel %vm58_vm0, %v44_v13, 0.0  ;;  %v70_v41 = vadd.f32 %v69_v20, %v68_v19 }
  0x13   :  { %v48_v17 = vld [vmem:[#allocation2 + $0xb0] sm:$0xff]  ;;  %v49_v22 = vld [vmem:[#allocation2 + $0xb8] sm:$0xff]  ;;  %v141_v29 = vsel %vm58_vm0, %v45_v14, 0.0  ;;  %v149_v30 = vsel %vm58_vm0, %v46_v15, 0.0  ;;  %v150_v31 = vsel %vm58_vm0, %v47_v16, 0.0  ;;  %v34_v32 = vld [vmem:[#allocation2 + $0x40] sm:$0xff]  ;;  %v79_v42 = vadd.f32 %v78_v25, %v77_v21 }
  0x14   :  { %211 = vperm.xlu0 %336, %v204_v2   ;;  %v32_v23 = vld [vmem:[#allocation2 + $0x30] sm:$0xff]  ;;  %v33_v24 = vld [vmem:[#allocation2 + $0x38] sm:$0xff]  ;;  %v35_v33 = vld [vmem:[#allocation2 + $0x48] sm:$0xff]  ;;  %v158_v35 = vsel %vm58_vm0, %v48_v17, 0.0  ;;  %v159_v36 = vsel %vm58_vm0, %v49_v22, 0.0  ;;  %v62_v46 = vrot.slane %v415_v18, 4  ;;  %v133_v47 = vadd.f32 %v132_v27, %v131_v26 }
  0x15   :  { %v36_v34 = vld [vmem:[#allocation2 + $0x50] sm:$0xff]  ;;  %v37_v37 = vld [vmem:[#allocation2 + $0x58] sm:$0xff]  ;;  %v38_v38 = vld [vmem:[#allocation2 + $0x60] sm:$0xff]  ;;  %v86_v39 = vsel %vm58_vm0, %v32_v23, 0.0  ;;  %v87_v40 = vsel %vm58_vm0, %v33_v24, 0.0  ;;  %v142_v48 = vadd.f32 %v141_v29, %v140_v28  ;;  %v151_v49 = vadd.f32 %v150_v31, %v149_v30  ;;  %s385_s0 = smov [#allocation5]  }
  0x16   :  { %v39_v43 = vld [vmem:[#allocation2 + $0x68] sm:$0xff]  ;;  %v40_v44 = vld [vmem:[#allocation2 + $0x70] sm:$0xff]  ;;  %v41_v45 = vld [vmem:[#allocation2 + $0x78] sm:$0xff]  ;;  %v160_v53 = vadd.f32 %v159_v36, %v158_v35  ;;  %v88_v57 = vadd.f32 %v87_v40, %v86_v39  ;;  %v95_v58 = vsel %vm58_vm0, %v34_v32, 0.0  ;;  %v96_v59 = vsel %vm58_vm0, %v35_v33, 0.0  ;;  %s319_s1 = sshll.u32 %s385_s0, 4  ;;  %s320_s1 = int_to_ptr.vmem [resolvable:$true] %s319_s1 }
  0x17   :  { %v50_v50 = vld [vmem:[#allocation2 + $0xc0] sm:$0xff]  ;;  %v51_v51 = vld [vmem:[#allocation2 + $0xc8] sm:$0xff]  ;;  %v52_v52 = vld [vmem:[#allocation2 + $0xd0] sm:$0xff]  ;;  %v104_v62 = vsel %vm58_vm0, %v36_v34, 0.0  ;;  %v105_v63 = vsel %vm58_vm0, %v37_v37, 0.0  ;;  %v113_v0 = vsel %vm58_vm0, %v38_v38, 0.0  ;;  %v97_v10 = vadd.f32 %v96_v59, %v95_v58  ;;  %p362_p6 = scmp.lt.s32.totalorder %s320_s1, %s320_s1 }
  0x18   :  { %v53_v54 = vld [vmem:[#allocation2 + $0xd8] sm:$0xff]  ;;  %v54_v55 = vld [vmem:[#allocation2 + $0xe0] sm:$0xff]  ;;  %v55_v56 = vld [vmem:[#allocation2 + $0xe8] sm:$0xff]  ;;  %v114_v1 = vsel %vm58_vm0, %v39_v43, 0.0  ;;  %v122_v2 = vsel %vm58_vm0, %v40_v44, 0.0  ;;  %v123_v3 = vsel %vm58_vm0, %v41_v45, 0.0  ;;  %v106_v11 = vadd.f32 %v105_v63, %v104_v62 }
  0x19   :  { %v56_v60 = vld [vmem:[#allocation2 + $0xf0] sm:$0xff]  ;;  %v57_v61 = vld [vmem:[#allocation2 + $0xf8] sm:$0xff]  ;;  %v167_v4 = vsel %vm58_vm0, %v50_v50, 0.0  ;;  %v168_v5 = vsel %vm58_vm0, %v51_v51, 0.0  ;;  %v176_v6 = vsel %vm58_vm0, %v52_v52, 0.0  ;;  %v177_v7 = vsel %vm58_vm0, %v53_v54, 0.0 }
  0x1a   :  { %v185_v8 = vsel %vm58_vm0, %v54_v55, 0.0  ;;  %v186_v9 = vsel %vm58_vm0, %v55_v56, 0.0  ;;  %v194_v12 = vsel %vm58_vm0, %v56_v60, 0.0  ;;  %v195_v13 = vsel %vm58_vm0, %v57_v61, 0.0  ;;  %s357_s20 = scalar_lea.vmem %s320_s1, 256 }
  0x1b   :  { %v71_v14 = vrot.slane %v70_v41, 4  ;;  %v80_v15 = vrot.slane %v79_v42, 4  ;;  %v115_v16 = vadd.f32 %v114_v1, %v113_v0  ;;  %v124_v17 = vadd.f32 %v123_v3, %v122_v2  ;;  %p358_p5 = scmp.ne.s32.totalorder %s320_s1, %s357_s20  ;;  %p363_p7 = scmp.lt.s32.totalorder %s357_s20, %s357_s20 }
  0x1c   :  { %v134_v19 = vrot.slane %v133_v47, 4  ;;  %v169_v20 = vadd.f32 %v168_v5, %v167_v4  ;;  %v178_v21 = vadd.f32 %v177_v7, %v176_v6  ;;  %v187_v22 = vadd.f32 %v186_v9, %v185_v8 }
  0x1d   :  { %v143_v23 = vrot.slane %v142_v48, 4  ;;  %v152_v24 = vrot.slane %v151_v49, 4  ;;  %v161_v25 = vrot.slane %v160_v53, 4  ;;  %v196_v26 = vadd.f32 %v195_v13, %v194_v12  ;;  %p364_p8 = por %p363_p7, %p362_p6 }
  0x1e   :  { %v63_v27 = vadd.f32 %v62_v46, %v415_v18  ;;  %v89_v28 = vrot.slane %v88_v57, 4  ;;  %v98_v29 = vrot.slane %v97_v10, 4  ;;  %v107_v30 = vrot.slane %v106_v11, 4 }
  0x1f   :  { %v72_v31 = vadd.f32 %v71_v14, %v70_v41  ;;  %v81_v32 = vadd.f32 %v80_v15, %v79_v42  ;;  %v116_v33 = vrot.slane %v115_v16, 4  ;;  %v125_v34 = vrot.slane %v124_v17, 4  ;;  %p365_p9 = pnand %p364_p8, %p358_p5 }
  0x20   :  { %v135_v35 = vadd.f32 %v134_v19, %v133_v47  ;;  %v170_v36 = vrot.slane %v169_v20, 4  ;;  %v179_v37 = vrot.slane %v178_v21, 4  ;;  %v188_v38 = vrot.slane %v187_v22, 4 }
  0x21   :  { %v144_v39 = vadd.f32 %v143_v23, %v142_v48  ;;  %v153_v40 = vadd.f32 %v152_v24, %v151_v49  ;;  %v162_v43 = vadd.f32 %v161_v25, %v160_v53  ;;  %v197_v44 = vrot.slane %v196_v26, 4 }
  0x22   :  { %v64_v45 = vrot.slane %v63_v27, 2  ;;  %v90_v50 = vadd.f32 %v89_v28, %v88_v57  ;;  %v99_v51 = vadd.f32 %v98_v29, %v97_v10  ;;  %v108_v52 = vadd.f32 %v107_v30, %v106_v11 }
  0x23   :  { %v73_v18 = vrot.slane %v72_v31, 2  ;;  %v82_v46 = vrot.slane %v81_v32, 2  ;;  %v117_v54 = vadd.f32 %v116_v33, %v115_v16  ;;  %v126_v55 = vadd.f32 %v125_v34, %v124_v17 }
  0x24   :  { %v136_v41 = vrot.slane %v135_v35, 2  ;;  %v171_v42 = vadd.f32 %v170_v36, %v169_v20  ;;  %v180_v56 = vadd.f32 %v179_v37, %v178_v21  ;;  %v189_v58 = vadd.f32 %v188_v38, %v187_v22 }
  0x25   :  { %v145_v47 = vrot.slane %v144_v39, 2  ;;  %v154_v59 = vrot.slane %v153_v40, 2  ;;  %v163_v60 = vrot.slane %v162_v43, 2  ;;  %v198_v61 = vadd.f32 %v197_v44, %v196_v26 }
  0x26   :  { %v65_v48 = vadd.f32 %v64_v45, %v63_v27  ;;  %v91_v49 = vrot.slane %v90_v50, 2  ;;  %v100_v53 = vrot.slane %v99_v51, 2  ;;  %v109_v62 = vrot.slane %v108_v52, 2 }
  0x27   :  { %v74_v63 = vadd.f32 %v73_v18, %v72_v31  ;;  %v83_v57 = vadd.f32 %v82_v46, %v81_v32  ;;  %v118_v0 = vrot.slane %v117_v54, 2  ;;  %v127_v1 = vrot.slane %v126_v55, 2 }
  0x28   :  { %v137_v2 = vadd.f32 %v136_v41, %v135_v35  ;;  %v172_v3 = vrot.slane %v171_v42, 2  ;;  %v181_v4 = vrot.slane %v180_v56, 2  ;;  %v190_v5 = vrot.slane %v189_v58, 2 }
  0x29   :  { %v146_v6 = vadd.f32 %v145_v47, %v144_v39  ;;  %v155_v7 = vadd.f32 %v154_v59, %v153_v40  ;;  %v164_v8 = vadd.f32 %v163_v60, %v162_v43  ;;  %v199_v9 = vrot.slane %v198_v61, 2 }
  0x2a   :  { %v66_v10 = vrot.slane %v65_v48, 1  ;;  %v92_v11 = vadd.f32 %v91_v49, %v90_v50  ;;  %v101_v12 = vadd.f32 %v100_v53, %v99_v51  ;;  %v110_v13 = vadd.f32 %v109_v62, %v108_v52 }
  0x2b   :  { %v75_v14 = vrot.slane %v74_v63, 1  ;;  %v84_v15 = vrot.slane %v83_v57, 1  ;;  %v119_v16 = vadd.f32 %v118_v0, %v117_v54  ;;  %v128_v17 = vadd.f32 %v127_v1, %v126_v55 }
  0x2c   :  { %v138_v19 = vrot.slane %v137_v2, 1  ;;  %v173_v20 = vadd.f32 %v172_v3, %v171_v42  ;;  %v182_v21 = vadd.f32 %v181_v4, %v180_v56  ;;  %v191_v22 = vadd.f32 %v190_v5, %v189_v58 }
  0x2d   :  { %v147_v23 = vrot.slane %v146_v6, 1  ;;  %v156_v24 = vrot.slane %v155_v7, 1  ;;  %v165_v25 = vrot.slane %v164_v8, 1  ;;  %v200_v26 = vadd.f32 %v199_v9, %v198_v61 }
  0x2e   :  { %v67_v27 = vadd.f32 %v66_v10, %v65_v48  ;;  %v93_v28 = vrot.slane %v92_v11, 1  ;;  %v102_v29 = vrot.slane %v101_v12, 1  ;;  %v111_v30 = vrot.slane %v110_v13, 1 }
  0x2f   :  { %v76_v31 = vadd.f32 %v75_v14, %v74_v63  ;;  %v85_v32 = vadd.f32 %v84_v15, %v83_v57  ;;  %v120_v33 = vrot.slane %v119_v16, 1  ;;  %v129_v34 = vrot.slane %v128_v17, 1 }
  0x30   :  { %v139_v35 = vadd.f32 %v138_v19, %v137_v2  ;;  %v174_v36 = vrot.slane %v173_v20, 1  ;;  %v183_v37 = vrot.slane %v182_v21, 1  ;;  %v192_v38 = vrot.slane %v191_v22, 1 }
  0x31   :  { %v148_v39 = vadd.f32 %v147_v23, %v146_v6  ;;  %v157_v40 = vadd.f32 %v156_v24, %v155_v7  ;;  %v166_v43 = vadd.f32 %v165_v25, %v164_v8  ;;  %v201_v44 = vrot.slane %v200_v26, 1 }
  0x32   :  { %v94_v50 = vadd.f32 %v93_v28, %v92_v11  ;;  %v103_v51 = vadd.f32 %v102_v29, %v101_v12  ;;  %v112_v52 = vadd.f32 %v111_v30, %v110_v13  ;;  %v121_v54 = vadd.f32 %v120_v33, %v119_v16 }
  0x33   :  { %v130_v55 = vadd.f32 %v129_v34, %v128_v17  ;;  %v175_v42 = vadd.f32 %v174_v36, %v173_v20  ;;  %v184_v56 = vadd.f32 %v183_v37, %v182_v21  ;;  %v193_v58 = vadd.f32 %v192_v38, %v191_v22 }
  0x34   :  { %v202_v60 = vadd.f32 %v201_v44, %v200_v26  ;;  %vm285_vm4 = vcmask 1044484   ;;  %vm288_vm5 = vcmask 1045509   ;;  %vm291_vm6 = vcmask 1046534  }
  0x35   :  { %vm294_vm7 = vcmask 1047559  }
  0x8b   :  { %v208_v45 = vpop.permute.xlu0 %207 }
  0x8c   :  { %v213_v18 = vrot.slane %v208_v45, 1  ;;  %v214_v46 = vrot.slane %v208_v45, 2  ;;  %v215_v41 = vrot.slane %v208_v45, 3  ;;  %v243_v47 = vmul.f32 %v208_v45, %v67_v27 }
  0x8d   :  { %v216_v61 = vrot.slane %v208_v45, 4  ;;  %v217_v53 = vrot.slane %v208_v45, 5  ;;  %v218_v62 = vrot.slane %v208_v45, 6  ;;  %v219_v63 = vrot.slane %v208_v45, 7 }
  0x8e   :  { %v244_v59 = vmul.f32 %v213_v18, %v76_v31  ;;  %v245_v48 = vmul.f32 %v214_v46, %v85_v32  ;;  %v246_v6 = vmul.f32 %v215_v41, %v94_v50 }
  0x8f   :  { %v212_v49 = vpop.permute.xlu0 %211  ;;  %v247_v12 = vmul.f32 %v216_v61, %v103_v51  ;;  %v248_v13 = vmul.f32 %v217_v53, %v112_v52  ;;  %v249_v20 = vmul.f32 %v218_v62, %v121_v54  ;;  %v250_v21 = vmul.f32 %v219_v63, %v130_v55 }
  0x90   :  { %v275_v57 = vrot.slane %v244_v59, 7  ;;  %v220_v0 = vrot.slane %v212_v49, 1  ;;  %v221_v1 = vrot.slane %v212_v49, 2  ;;  %v222_v2 = vrot.slane %v212_v49, 3 }
  0x91   :  { %v223_v3 = vrot.slane %v212_v49, 4  ;;  %v224_v4 = vrot.slane %v212_v49, 5  ;;  %v225_v5 = vrot.slane %v212_v49, 6  ;;  %v226_v10 = vrot.slane %v212_v49, 7 }
  0x92   :  { %v252_v7 = vmul.f32 %v220_v0, %v148_v39  ;;  %v253_v8 = vmul.f32 %v221_v1, %v157_v40  ;;  %v254_v9 = vmul.f32 %v222_v2, %v166_v43  ;;  %v251_v11 = vmul.f32 %v212_v49, %v139_v35 }
  0x93   :  { %v255_v14 = vmul.f32 %v223_v3, %v175_v42  ;;  %v256_v17 = vmul.f32 %v224_v4, %v184_v56  ;;  %v277_v19 = vsel %vm276_vm1, %v275_v57, %v243_v47  ;;  %v257_v22 = vmul.f32 %v225_v5, %v193_v58 }
  0x94   :  { %v296_v15 = vrot.slane %v252_v7, 7  ;;  %v298_v16 = vrot.slane %v253_v8, 6  ;;  %v278_v23 = vrot.slane %v245_v48, 6  ;;  %v300_v24 = vrot.slane %v254_v9, 5 }
  0x95   :  { %v258_v25 = vmul.f32 %v226_v10, %v202_v60  ;;  %v281_v26 = vrot.slane %v246_v6, 5  ;;  %v284_v29 = vrot.slane %v247_v12, 4  ;;  %v302_v31 = vrot.slane %v255_v14, 4 }
  0x96   :  { %v297_v27 = vsel %vm276_vm1, %v296_v15, %v251_v11  ;;  %v280_v28 = vsel %vm279_vm2, %v278_v23, %v277_v19  ;;  %v287_v33 = vrot.slane %v248_v13, 3  ;;  %v304_v35 = vrot.slane %v256_v17, 3 }
  0x97   :  { %v299_v30 = vsel %vm279_vm2, %v298_v16, %v297_v27  ;;  %v283_v32 = vsel %vm282_vm3, %v281_v26, %v280_v28  ;;  %v290_v37 = vrot.slane %v249_v20, 2  ;;  %v306_v39 = vrot.slane %v257_v22, 2 }
  0x98   :  { %v301_v34 = vsel %vm282_vm3, %v300_v24, %v299_v30  ;;  %v286_v36 = vsel %vm285_vm4, %v284_v29, %v283_v32  ;;  %v293_v43 = vrot.slane %v250_v21, 1  ;;  %v308_v45 = vrot.slane %v258_v25, 1 }
  0x99   :  { %v303_v38 = vsel %vm285_vm4, %v302_v31, %v301_v34  ;;  %v289_v40 = vsel %vm288_vm5, %v287_v33, %v286_v36 }
  0x9a   :  { %v305_v44 = vsel %vm288_vm5, %v304_v35, %v303_v38  ;;  %v292_v50 = vsel %vm291_vm6, %v290_v37, %v289_v40 }
  0x9b   :  { %v307_v51 = vsel %vm291_vm6, %v306_v39, %v305_v44  ;;  %v295_v52 = vsel %vm294_vm7, %v293_v43, %v292_v50 }
  0x9c   :  { %v309_v18 = vsel %vm294_vm7, %v308_v45, %v307_v51  ;;  %312 = vst.msk [vmem:[#allocation5] sm:$0xff] %vm58_vm0, %v295_v52 }
  0x9d   :  { %313 = vst.msk [vmem:[#allocation5 + $0x8] sm:$0xff] %vm58_vm0, %v309_v18 }
  0x9e   :  { %368 = shalt.err (!%p365_p9)
}
  0x9f   :  { %325 = dma.vmem_to_hbm [thread:$0]  %s320_s1, 256, %s473_s2, [#allocation4], %s382_s12, %s382_s12, %s383_s13  }
  0xa0   :  { %379 = dma.done.wait [#allocation4], 256  }
  0xa1   :  { %380 = vsyncadd [#allocation4], 4294967040 }
  0xa2   :  { %329 = vsyncpa [#allocation3], 1 }
  0xa3   :  { %330 = vsyncpa [#allocation4], 1 }

</bundles_post_ra>
